<compile_context>
chip_gen: v5e
topology: v5e:2x2
jax: 0.10.0
libtpu: 0.0.40
codegen_flags: <defaults>
</compile_context>

<pallas_src>
import functools

import numpy as np

import jax
import jax.numpy as jnp
from jax.experimental import pallas as pl
from jax.experimental.pallas import tpu as pltpu


# Tap enumeration order shared by the masks, the weight flattening and the kernel:
# t = di * 3 + dj for kernel index (di, dj), with spatial offsets (oi, oj) = (di-1, dj-1).
_TAP_OFFSETS = tuple((oi, oj) for oi in (-1, 0, 1) for oj in (-1, 0, 1))


# ---------------------------------------------------------------------------
# In-kernel helpers
# ---------------------------------------------------------------------------
def _shifted(x, flat_shift, pixels):
    """result[:, p] = x[:, (p + flat_shift) mod pixels]  (circular lane rotation).

    Wrapped / out-of-image positions are zeroed afterwards by the per-tap masks,
    which makes this exactly the zero-padded 3x3 neighbourhood access of Conv2d.
    """
    if flat_shift == 0:
        return x
    return pltpu.roll(x, shift=(-flat_shift) % pixels, axis=1)


def _conv3x3_bias_relu(x, masks_ref, w_ref, b_ref, *, cin, width, pixels):
    """3x3 'SAME' conv + bias + ReLU; patch built in registers, one MXU matmul.

    x:         [cin, pixels]   f32, CHW-flattened (pixel p = h*width + w).
    masks_ref: [9*cin, pixels] f32 per-(tap,channel) validity masks (1 inside image,
               0 at padding); row order (tap, cin) matches the patch / weight layout,
               so each tap's mask load is a plain same-shape slice (no broadcasts).
    w_ref:     [cout, 9*cin]   bf16 weights, columns ordered (tap, cin).
    b_ref:     [cout, 1]       f32 bias (post-matmul VPU add).
    returns    [cout, pixels]  f32.
    """
    slabs = []
    for t, (oi, oj) in enumerate(_TAP_OFFSETS):
        shifted = _shifted(x, oi * width + oj, pixels)
        masked = shifted * masks_ref[pl.ds(t * cin, cin), :]          # f32 VPU
        slabs.append(masked.astype(jnp.bfloat16))                     # MXU operand
    patch = jnp.concatenate(slabs, axis=0)                            # [9*cin, pixels] bf16
    acc = jnp.dot(w_ref[...], patch, preferred_element_type=jnp.float32)
    return jnp.maximum(acc + b_ref[...], 0.0)                         # f32 bias + ReLU


# ---------------------------------------------------------------------------
# Pallas kernels
# ---------------------------------------------------------------------------
def _cnn_features_kernel(x_ref, m1_ref, m2_ref, w1_ref, b1_ref, w2_ref, b2_ref,
                         feat_ref, *, cin, c1, width, pixels):
    """conv1+ReLU -> conv2+ReLU, output [c2, H*W]."""
    a1 = _conv3x3_bias_relu(x_ref[...], m1_ref, w1_ref, b1_ref,
                            cin=cin, width=width, pixels=pixels)
    a2 = _conv3x3_bias_relu(a1, m2_ref, w2_ref, b2_ref,
                            cin=c1, width=width, pixels=pixels)
    feat_ref[...] = a2


def _snn_forward_kernel(x_ref, m1_ref, m2_ref, w1_ref, b1_ref, w2_ref, b2_ref,
                        tfeat_ref, diff_ref, *, cin, c1, width, pixels):
    """Fused SNN forward: diff = target_features - CNN(env).  Single output slab."""
    a1 = _conv3x3_bias_relu(x_ref[...], m1_ref, w1_ref, b1_ref,
                            cin=cin, width=width, pixels=pixels)
    a2 = _conv3x3_bias_relu(a1, m2_ref, w2_ref, b2_ref,
                            cin=c1, width=width, pixels=pixels)
    diff_ref[...] = tfeat_ref[...] - a2


# ---------------------------------------------------------------------------
# Host-side helpers / jitted wrappers
# ---------------------------------------------------------------------------
@functools.lru_cache(maxsize=None)
def _tap_masks_np(height, width):
    """[9, H*W] float32: mask[t, p] = 1 iff the 3x3 tap t at pixel p is inside the image."""
    pixels = height * width
    h = np.arange(pixels) // width
    w = np.arange(pixels) % width
    rows = []
    for oi, oj in _TAP_OFFSETS:
        valid = (h + oi >= 0) & (h + oi < height) & (w + oj >= 0) & (w + oj < width)
        rows.append(valid.astype(np.float32))
    return np.stack(rows, axis=0)


@functools.lru_cache(maxsize=None)
def _expanded_tap_masks(height, width, reps):
    """[9*reps, H*W]: tap mask t repeated `reps` times (row order (tap, cin))."""
    return jnp.asarray(np.repeat(_tap_masks_np(height, width), reps, axis=0))


def _flatten_weight(w):
    """[cout, cin, 3, 3] -> bf16 [cout, 9*cin] with (tap, cin) column order."""
    cout, cin = w.shape[0], w.shape[1]
    return jnp.transpose(w, (0, 2, 3, 1)).reshape(cout, 9 * cin).astype(jnp.bfloat16)


def _common_in_specs(cin, c1, c2, pixels):
    return [
        pl.BlockSpec((cin, pixels), lambda i: (0, 0)),        # image, CHW-flat
        pl.BlockSpec((9 * cin, pixels), lambda i: (0, 0)),    # conv1 masks (tap, cin)
        pl.BlockSpec((9 * c1, pixels), lambda i: (0, 0)),     # conv2 masks (tap, c1)
        pl.BlockSpec((c1, 9 * cin), lambda i: (0, 0)),        # conv1 weight (bf16)
        pl.BlockSpec((c1, 1), lambda i: (0, 0)),              # conv1 bias   (f32)
        pl.BlockSpec((c2, 9 * c1), lambda i: (0, 0)),         # conv2 weight (bf16)
        pl.BlockSpec((c2, 1), lambda i: (0, 0)),              # conv2 bias   (f32)
    ]


@jax.jit
def _cnn_features_call(image_chw, masks1, masks2, w1, b1, w2, b2):
    cin, height, width = image_chw.shape
    pixels = height * width
    c1, c2 = w1.shape[0], w2.shape[0]
    x = image_chw.reshape(cin, pixels).astype(jnp.float32)
    kern = functools.partial(_cnn_features_kernel, cin=cin, c1=c1,
                             width=width, pixels=pixels)
    feat = pl.pallas_call(
        kern,
        out_shape=jax.ShapeDtypeStruct((c2, pixels), jnp.float32),
        grid=(1,),
        in_specs=_common_in_specs(cin, c1, c2, pixels),
        out_specs=pl.BlockSpec((c2, pixels), lambda i: (0, 0)),
        compiler_params=pltpu.CompilerParams(dimension_semantics=("arbitrary",)),
    )(x, masks1, masks2, w1, b1, w2, b2)
    return feat.reshape(c2, height, width)


@jax.jit
def _snn_forward_call(image_chw, target_feat, masks1, masks2, w1, b1, w2, b2):
    cin, height, width = image_chw.shape
    pixels = height * width
    c1, c2 = w1.shape[0], w2.shape[0]
    x = image_chw.reshape(cin, pixels).astype(jnp.float32)
    tflat = target_feat.reshape(c2, pixels).astype(jnp.float32)   # reshape only, no transpose
    in_specs = _common_in_specs(cin, c1, c2, pixels) + [
        pl.BlockSpec((c2, pixels), lambda i: (0, 0)),             # cached target features
    ]
    kern = functools.partial(_snn_forward_kernel, cin=cin, c1=c1,
                             width=width, pixels=pixels)
    diff = pl.pallas_call(
        kern,
        out_shape=jax.ShapeDtypeStruct((c2, pixels), jnp.float32),
        grid=(1,),
        in_specs=in_specs,
        out_specs=pl.BlockSpec((c2, pixels), lambda i: (0, 0)),
        compiler_params=pltpu.CompilerParams(dimension_semantics=("arbitrary",)),
    )(x, masks1, masks2, w1, b1, w2, b2, tflat)
    return diff.reshape(c2, height, width)


# ---------------------------------------------------------------------------
# Modules
# ---------------------------------------------------------------------------
class CNN:
    """2x (Conv2d 3x3 pad=1 + ReLU) feature extractor, deterministic init."""

    def __init__(self, in_channels=1, c1=8, c2=16, seed=0):
        k1, k2, k3, k4 = jax.random.split(jax.random.PRNGKey(seed), 4)
        # Keep f32 originals for the XLA reference check in __main__.
        self.w1 = 0.1 * jax.random.normal(k1, (c1, in_channels, 3, 3), jnp.float32)
        self.b1 = 0.1 * jax.random.normal(k2, (c1,), jnp.float32)
        self.w2 = 0.1 * jax.random.normal(k3, (c2, c1, 3, 3), jnp.float32)
        self.b2 = 0.1 * jax.random.normal(k4, (c2,), jnp.float32)
        # Kernel-side parameters: bf16 weight matrices, f32 bias columns.
        self.w1_mat = _flatten_weight(self.w1)
        self.b1_col = self.b1.reshape(c1, 1).astype(jnp.float32)
        self.w2_mat = _flatten_weight(self.w2)
        self.b2_col = self.b2.reshape(c2, 1).astype(jnp.float32)
        self.in_channels, self.c1, self.c2 = in_channels, c1, c2

    def forward(self, image_chw):
        """image_chw: [C, H, W] -> features [c2, H, W] (PyTorch CHW order)."""
        image_chw = jnp.asarray(image_chw, jnp.float32)
        cin, height, width = image_chw.shape
        masks1 = _expanded_tap_masks(height, width, cin)
        masks2 = _expanded_tap_masks(height, width, self.c1)
        return _cnn_features_call(image_chw, masks1, masks2,
                                  self.w1_mat, self.b1_col, self.w2_mat, self.b2_col)


class SNN:
    """Siamese network: forward returns cnn(target) - cnn(environment), shape [c2, H, W]."""

    def __init__(self, image_target):
        image_target = jnp.asarray(image_target, jnp.float32)
        self.cnn = CNN(in_channels=image_target.shape[0])
        self.target = self.cnn.forward(image_target)   # cached CHW target features
        self.image_environement = None
        self._env_image = None

    def forward(self, image_environement):
        image_environement = jnp.asarray(image_environement, jnp.float32)
        cin, height, width = image_environement.shape
        masks1 = _expanded_tap_masks(height, width, cin)
        masks2 = _expanded_tap_masks(height, width, self.cnn.c1)
        diff = _snn_forward_call(
            image_environement, self.target, masks1, masks2,
            self.cnn.w1_mat, self.cnn.b1_col, self.cnn.w2_mat, self.cnn.b2_col)
        # Per the perf review: the fused kernel writes only the diff (halves output
        # writeback); env features are computed lazily if get_features() is consumed.
        self._env_image = image_environement
        self.image_environement = None
        return diff

    def get_features(self):
        if self.image_environement is None and self._env_image is not None:
            self.image_environement = self.cnn.forward(self._env_image)
        return (self.target, self.image_environement)


# ---------------------------------------------------------------------------
# Main
# ---------------------------------------------------------------------------
if __name__ == "__main__":
    key = jax.random.PRNGKey(0)
    k_t, k_e = jax.random.split(key)

    C, H, W = 1, 16, 16   # single-channel 16x16 image, like the brick-grid env
    image_target = jax.random.uniform(k_t, (C, H, W), jnp.float32)
    image_env = jax.random.uniform(k_e, (C, H, W), jnp.float32)

    snn = SNN(image_target)
    out = jax.block_until_ready(snn.forward(image_env))

    assert out.shape == (snn.cnn.c2, H, W), out.shape
    assert out.dtype == jnp.float32
    assert bool(jnp.all(jnp.isfinite(out)))

    # Lazy env-feature path (get_features) must still work.
    t_feat, e_feat = snn.get_features()
    assert t_feat.shape == (snn.cnn.c2, H, W) and e_feat.shape == (snn.cnn.c2, H, W)
    assert bool(jnp.all(jnp.isfinite(e_feat)))

    # Numerical check against a plain-JAX (XLA) f32 reference of the same CNN.
    def _ref_cnn(img):
        x = img[None].astype(jnp.float32)
        y = jax.lax.conv_general_dilated(
            x, snn.cnn.w1, (1, 1), "SAME",
            dimension_numbers=("NCHW", "OIHW", "NCHW"),
            precision=jax.lax.Precision.HIGHEST)
        y = jnp.maximum(y + snn.cnn.b1[None, :, None, None], 0.0)
        y = jax.lax.conv_general_dilated(
            y, snn.cnn.w2, (1, 1), "SAME",
            dimension_numbers=("NCHW", "OIHW", "NCHW"),
            precision=jax.lax.Precision.HIGHEST)
        y = jnp.maximum(y + snn.cnn.b2[None, :, None, None], 0.0)
        return y[0]

    ref = _ref_cnn(image_target) - _ref_cnn(image_env)
    max_err = float(jnp.max(jnp.abs(out - ref)))
    assert jnp.allclose(out, ref, atol=5e-2, rtol=5e-2), max_err

    print("KERNEL_OK")
</pallas_src>

<mosaic_0001>
module attributes {stable_mosaic.version = 11 : i64} {
  func.func @_cnn_features_kernel(%arg0: i32, %arg1: memref<1x256xf32, #tpu.memory_space<vmem>>, %arg2: memref<9x256xf32, #tpu.memory_space<vmem>>, %arg3: memref<72x256xf32, #tpu.memory_space<vmem>>, %arg4: memref<8x9xbf16, #tpu.memory_space<vmem>>, %arg5: memref<8x1xf32, #tpu.memory_space<vmem>>, %arg6: memref<16x72xbf16, #tpu.memory_space<vmem>>, %arg7: memref<16x1xf32, #tpu.memory_space<vmem>>, %arg8: memref<16x256xf32, #tpu.memory_space<vmem>>) attributes {dimension_semantics = [#tpu.dimension_semantics<arbitrary>], iteration_bounds = array<i64: 1>, scalar_prefetch = 0 : i64, scratch_operands = 0 : i64, tpu.core_type = #tpu.core_type<tc>, window_params = [{pipeline_mode = #tpu.pipeline_mode<synchronous>, transform_indices = @transform_0, window_bounds = array<i64: 1, 256>}, {pipeline_mode = #tpu.pipeline_mode<synchronous>, transform_indices = @transform_1, window_bounds = array<i64: 9, 256>}, {pipeline_mode = #tpu.pipeline_mode<synchronous>, transform_indices = @transform_2, window_bounds = array<i64: 72, 256>}, {pipeline_mode = #tpu.pipeline_mode<synchronous>, transform_indices = @transform_3, window_bounds = array<i64: 8, 9>}, {pipeline_mode = #tpu.pipeline_mode<synchronous>, transform_indices = @transform_4, window_bounds = array<i64: 8, 1>}, {pipeline_mode = #tpu.pipeline_mode<synchronous>, transform_indices = @transform_5, window_bounds = array<i64: 16, 72>}, {pipeline_mode = #tpu.pipeline_mode<synchronous>, transform_indices = @transform_6, window_bounds = array<i64: 16, 1>}, {pipeline_mode = #tpu.pipeline_mode<synchronous>, transform_indices = @transform_7, window_bounds = array<i64: 16, 256>}]} {
    %c0 = arith.constant 0 : index
    %c0_0 = arith.constant 0 : index
    %0 = vector.load %arg1[%c0, %c0_0] : memref<1x256xf32, #tpu.memory_space<vmem>>, vector<1x256xf32>
    %c17_i32 = arith.constant 17 : i32
    %1 = tpu.dynamic_rotate %0 by %c17_i32 dim 1 : vector<1x256xf32>, i32 -> vector<1x256xf32>
    %c0_1 = arith.constant 0 : index
    %c0_2 = arith.constant 0 : index
    %2 = vector.load %arg2[%c0_1, %c0_2] : memref<9x256xf32, #tpu.memory_space<vmem>>, vector<1x256xf32>
    %3 = arith.mulf %1, %2 : vector<1x256xf32>
    %4 = arith.truncf %3 : vector<1x256xf32> to vector<1x256xbf16>
    %c16_i32 = arith.constant 16 : i32
    %5 = tpu.dynamic_rotate %0 by %c16_i32 dim 1 : vector<1x256xf32>, i32 -> vector<1x256xf32>
    %c1 = arith.constant 1 : index
    %c0_3 = arith.constant 0 : index
    %6 = vector.load %arg2[%c1, %c0_3] : memref<9x256xf32, #tpu.memory_space<vmem>>, vector<1x256xf32>
    %7 = arith.mulf %5, %6 : vector<1x256xf32>
    %8 = arith.truncf %7 : vector<1x256xf32> to vector<1x256xbf16>
    %c15_i32 = arith.constant 15 : i32
    %9 = tpu.dynamic_rotate %0 by %c15_i32 dim 1 : vector<1x256xf32>, i32 -> vector<1x256xf32>
    %c2 = arith.constant 2 : index
    %c0_4 = arith.constant 0 : index
    %10 = vector.load %arg2[%c2, %c0_4] : memref<9x256xf32, #tpu.memory_space<vmem>>, vector<1x256xf32>
    %11 = arith.mulf %9, %10 : vector<1x256xf32>
    %12 = arith.truncf %11 : vector<1x256xf32> to vector<1x256xbf16>
    %c1_i32 = arith.constant 1 : i32
    %13 = tpu.dynamic_rotate %0 by %c1_i32 dim 1 : vector<1x256xf32>, i32 -> vector<1x256xf32>
    %c3 = arith.constant 3 : index
    %c0_5 = arith.constant 0 : index
    %14 = vector.load %arg2[%c3, %c0_5] : memref<9x256xf32, #tpu.memory_space<vmem>>, vector<1x256xf32>
    %15 = arith.mulf %13, %14 : vector<1x256xf32>
    %16 = arith.truncf %15 : vector<1x256xf32> to vector<1x256xbf16>
    %c4 = arith.constant 4 : index
    %c0_6 = arith.constant 0 : index
    %17 = vector.load %arg2[%c4, %c0_6] : memref<9x256xf32, #tpu.memory_space<vmem>>, vector<1x256xf32>
    %18 = arith.mulf %0, %17 : vector<1x256xf32>
    %19 = arith.truncf %18 : vector<1x256xf32> to vector<1x256xbf16>
    %c255_i32 = arith.constant 255 : i32
    %20 = tpu.dynamic_rotate %0 by %c255_i32 dim 1 : vector<1x256xf32>, i32 -> vector<1x256xf32>
    %c5 = arith.constant 5 : index
    %c0_7 = arith.constant 0 : index
    %21 = vector.load %arg2[%c5, %c0_7] : memref<9x256xf32, #tpu.memory_space<vmem>>, vector<1x256xf32>
    %22 = arith.mulf %20, %21 : vector<1x256xf32>
    %23 = arith.truncf %22 : vector<1x256xf32> to vector<1x256xbf16>
    %c241_i32 = arith.constant 241 : i32
    %24 = tpu.dynamic_rotate %0 by %c241_i32 dim 1 : vector<1x256xf32>, i32 -> vector<1x256xf32>
    %c6 = arith.constant 6 : index
    %c0_8 = arith.constant 0 : index
    %25 = vector.load %arg2[%c6, %c0_8] : memref<9x256xf32, #tpu.memory_space<vmem>>, vector<1x256xf32>
    %26 = arith.mulf %24, %25 : vector<1x256xf32>
    %27 = arith.truncf %26 : vector<1x256xf32> to vector<1x256xbf16>
    %c240_i32 = arith.constant 240 : i32
    %28 = tpu.dynamic_rotate %0 by %c240_i32 dim 1 : vector<1x256xf32>, i32 -> vector<1x256xf32>
    %c7 = arith.constant 7 : index
    %c0_9 = arith.constant 0 : index
    %29 = vector.load %arg2[%c7, %c0_9] : memref<9x256xf32, #tpu.memory_space<vmem>>, vector<1x256xf32>
    %30 = arith.mulf %28, %29 : vector<1x256xf32>
    %31 = arith.truncf %30 : vector<1x256xf32> to vector<1x256xbf16>
    %c239_i32 = arith.constant 239 : i32
    %32 = tpu.dynamic_rotate %0 by %c239_i32 dim 1 : vector<1x256xf32>, i32 -> vector<1x256xf32>
    %c8 = arith.constant 8 : index
    %c0_10 = arith.constant 0 : index
    %33 = vector.load %arg2[%c8, %c0_10] : memref<9x256xf32, #tpu.memory_space<vmem>>, vector<1x256xf32>
    %34 = arith.mulf %32, %33 : vector<1x256xf32>
    %35 = arith.truncf %34 : vector<1x256xf32> to vector<1x256xbf16>
    %36 = tpu.concatenate %4, %8, %12, %16, %19, %23, %27, %31, %35 in 0 : vector<1x256xbf16>, vector<1x256xbf16>, vector<1x256xbf16>, vector<1x256xbf16>, vector<1x256xbf16>, vector<1x256xbf16>, vector<1x256xbf16>, vector<1x256xbf16>, vector<1x256xbf16> -> vector<9x256xbf16>
    %c0_11 = arith.constant 0 : index
    %c0_12 = arith.constant 0 : index
    %37 = vector.load %arg4[%c0_11, %c0_12] : memref<8x9xbf16, #tpu.memory_space<vmem>>, vector<8x9xbf16>
    %cst = arith.constant dense<0.000000e+00> : vector<8x256xf32>
    %38 = tpu.matmul %37, %36, %cst {dimension_numbers = #tpu.dot_dimension_numbers<[1], [0], [0], [1], [0, 0, 1, 1], [], []>} : vector<8x9xbf16>, vector<9x256xbf16>, vector<8x256xf32> -> vector<8x256xf32>
    %c0_13 = arith.constant 0 : index
    %c0_14 = arith.constant 0 : index
    %39 = vector.load %arg5[%c0_13, %c0_14] : memref<8x1xf32, #tpu.memory_space<vmem>>, vector<8x1xf32>
    %40 = vector.broadcast %39 : vector<8x1xf32> to vector<8x256xf32>
    %41 = arith.addf %38, %40 : vector<8x256xf32>
    %cst_15 = arith.constant 0.000000e+00 : f32
    %42 = vector.broadcast %cst_15 : f32 to vector<8x256xf32>
    %43 = arith.maximumf %41, %42 : vector<8x256xf32>
    %c17_i32_16 = arith.constant 17 : i32
    %44 = tpu.dynamic_rotate %43 by %c17_i32_16 dim 1 : vector<8x256xf32>, i32 -> vector<8x256xf32>
    %c0_17 = arith.constant 0 : index
    %c0_18 = arith.constant 0 : index
    %45 = vector.load %arg3[%c0_17, %c0_18] : memref<72x256xf32, #tpu.memory_space<vmem>>, vector<8x256xf32>
    %46 = arith.mulf %44, %45 : vector<8x256xf32>
    %47 = arith.truncf %46 : vector<8x256xf32> to vector<8x256xbf16>
    %c16_i32_19 = arith.constant 16 : i32
    %48 = tpu.dynamic_rotate %43 by %c16_i32_19 dim 1 : vector<8x256xf32>, i32 -> vector<8x256xf32>
    %c8_20 = arith.constant 8 : index
    %c0_21 = arith.constant 0 : index
    %49 = vector.load %arg3[%c8_20, %c0_21] : memref<72x256xf32, #tpu.memory_space<vmem>>, vector<8x256xf32>
    %50 = arith.mulf %48, %49 : vector<8x256xf32>
    %51 = arith.truncf %50 : vector<8x256xf32> to vector<8x256xbf16>
    %c15_i32_22 = arith.constant 15 : i32
    %52 = tpu.dynamic_rotate %43 by %c15_i32_22 dim 1 : vector<8x256xf32>, i32 -> vector<8x256xf32>
    %c16 = arith.constant 16 : index
    %c0_23 = arith.constant 0 : index
    %53 = vector.load %arg3[%c16, %c0_23] : memref<72x256xf32, #tpu.memory_space<vmem>>, vector<8x256xf32>
    %54 = arith.mulf %52, %53 : vector<8x256xf32>
    %55 = arith.truncf %54 : vector<8x256xf32> to vector<8x256xbf16>
    %c1_i32_24 = arith.constant 1 : i32
    %56 = tpu.dynamic_rotate %43 by %c1_i32_24 dim 1 : vector<8x256xf32>, i32 -> vector<8x256xf32>
    %c24 = arith.constant 24 : index
    %c0_25 = arith.constant 0 : index
    %57 = vector.load %arg3[%c24, %c0_25] : memref<72x256xf32, #tpu.memory_space<vmem>>, vector<8x256xf32>
    %58 = arith.mulf %56, %57 : vector<8x256xf32>
    %59 = arith.truncf %58 : vector<8x256xf32> to vector<8x256xbf16>
    %c32 = arith.constant 32 : index
    %c0_26 = arith.constant 0 : index
    %60 = vector.load %arg3[%c32, %c0_26] : memref<72x256xf32, #tpu.memory_space<vmem>>, vector<8x256xf32>
    %61 = arith.mulf %43, %60 : vector<8x256xf32>
    %62 = arith.truncf %61 : vector<8x256xf32> to vector<8x256xbf16>
    %c255_i32_27 = arith.constant 255 : i32
    %63 = tpu.dynamic_rotate %43 by %c255_i32_27 dim 1 : vector<8x256xf32>, i32 -> vector<8x256xf32>
    %c40 = arith.constant 40 : index
    %c0_28 = arith.constant 0 : index
    %64 = vector.load %arg3[%c40, %c0_28] : memref<72x256xf32, #tpu.memory_space<vmem>>, vector<8x256xf32>
    %65 = arith.mulf %63, %64 : vector<8x256xf32>
    %66 = arith.truncf %65 : vector<8x256xf32> to vector<8x256xbf16>
    %c241_i32_29 = arith.constant 241 : i32
    %67 = tpu.dynamic_rotate %43 by %c241_i32_29 dim 1 : vector<8x256xf32>, i32 -> vector<8x256xf32>
    %c48 = arith.constant 48 : index
    %c0_30 = arith.constant 0 : index
    %68 = vector.load %arg3[%c48, %c0_30] : memref<72x256xf32, #tpu.memory_space<vmem>>, vector<8x256xf32>
    %69 = arith.mulf %67, %68 : vector<8x256xf32>
    %70 = arith.truncf %69 : vector<8x256xf32> to vector<8x256xbf16>
    %c240_i32_31 = arith.constant 240 : i32
    %71 = tpu.dynamic_rotate %43 by %c240_i32_31 dim 1 : vector<8x256xf32>, i32 -> vector<8x256xf32>
    %c56 = arith.constant 56 : index
    %c0_32 = arith.constant 0 : index
    %72 = vector.load %arg3[%c56, %c0_32] : memref<72x256xf32, #tpu.memory_space<vmem>>, vector<8x256xf32>
    %73 = arith.mulf %71, %72 : vector<8x256xf32>
    %74 = arith.truncf %73 : vector<8x256xf32> to vector<8x256xbf16>
    %c239_i32_33 = arith.constant 239 : i32
    %75 = tpu.dynamic_rotate %43 by %c239_i32_33 dim 1 : vector<8x256xf32>, i32 -> vector<8x256xf32>
    %c64 = arith.constant 64 : index
    %c0_34 = arith.constant 0 : index
    %76 = vector.load %arg3[%c64, %c0_34] : memref<72x256xf32, #tpu.memory_space<vmem>>, vector<8x256xf32>
    %77 = arith.mulf %75, %76 : vector<8x256xf32>
    %78 = arith.truncf %77 : vector<8x256xf32> to vector<8x256xbf16>
    %79 = tpu.concatenate %47, %51, %55, %59, %62, %66, %70, %74, %78 in 0 : vector<8x256xbf16>, vector<8x256xbf16>, vector<8x256xbf16>, vector<8x256xbf16>, vector<8x256xbf16>, vector<8x256xbf16>, vector<8x256xbf16>, vector<8x256xbf16>, vector<8x256xbf16> -> vector<72x256xbf16>
    %c0_35 = arith.constant 0 : index
    %c0_36 = arith.constant 0 : index
    %80 = vector.load %arg6[%c0_35, %c0_36] : memref<16x72xbf16, #tpu.memory_space<vmem>>, vector<16x72xbf16>
    %cst_37 = arith.constant dense<0.000000e+00> : vector<16x256xf32>
    %81 = tpu.matmul %80, %79, %cst_37 {dimension_numbers = #tpu.dot_dimension_numbers<[1], [0], [0], [1], [0, 0, 1, 1], [], []>} : vector<16x72xbf16>, vector<72x256xbf16>, vector<16x256xf32> -> vector<16x256xf32>
    %c0_38 = arith.constant 0 : index
    %c0_39 = arith.constant 0 : index
    %82 = vector.load %arg7[%c0_38, %c0_39] : memref<16x1xf32, #tpu.memory_space<vmem>>, vector<16x1xf32>
    %83 = vector.broadcast %82 : vector<16x1xf32> to vector<16x256xf32>
    %84 = arith.addf %81, %83 : vector<16x256xf32>
    %cst_40 = arith.constant 0.000000e+00 : f32
    %85 = vector.broadcast %cst_40 : f32 to vector<16x256xf32>
    %86 = arith.maximumf %84, %85 : vector<16x256xf32>
    %c0_41 = arith.constant 0 : index
    %c0_42 = arith.constant 0 : index
    %87 = vector.load %arg8[%c0_41, %c0_42] : memref<16x256xf32, #tpu.memory_space<vmem>>, vector<16x256xf32>
    tpu.vector_store %arg8[%c0_41, %c0_42], %86 {strides = array<i32>} : memref<16x256xf32, #tpu.memory_space<vmem>>, vector<16x256xf32>,
    return
  }
  func.func @transform_0(%arg0: i32) -> (i32, i32) {
    %c0_i32 = arith.constant 0 : i32
    %c0_i32_0 = arith.constant 0 : i32
    %c0_i32_1 = arith.constant 0 : i32
    return %c0_i32, %c0_i32_0 : i32, i32
  }
  func.func @transform_1(%arg0: i32) -> (i32, i32) {
    %c0_i32 = arith.constant 0 : i32
    %c0_i32_0 = arith.constant 0 : i32
    %c0_i32_1 = arith.constant 0 : i32
    return %c0_i32, %c0_i32_0 : i32, i32
  }
  func.func @transform_2(%arg0: i32) -> (i32, i32) {
    %c0_i32 = arith.constant 0 : i32
    %c0_i32_0 = arith.constant 0 : i32
    %c0_i32_1 = arith.constant 0 : i32
    return %c0_i32, %c0_i32_0 : i32, i32
  }
  func.func @transform_3(%arg0: i32) -> (i32, i32) {
    %c0_i32 = arith.constant 0 : i32
    %c0_i32_0 = arith.constant 0 : i32
    %c0_i32_1 = arith.constant 0 : i32
    return %c0_i32, %c0_i32_0 : i32, i32
  }
  func.func @transform_4(%arg0: i32) -> (i32, i32) {
    %c0_i32 = arith.constant 0 : i32
    %c0_i32_0 = arith.constant 0 : i32
    %c0_i32_1 = arith.constant 0 : i32
    return %c0_i32, %c0_i32_0 : i32, i32
  }
  func.func @transform_5(%arg0: i32) -> (i32, i32) {
    %c0_i32 = arith.constant 0 : i32
    %c0_i32_0 = arith.constant 0 : i32
    %c0_i32_1 = arith.constant 0 : i32
    return %c0_i32, %c0_i32_0 : i32, i32
  }
  func.func @transform_6(%arg0: i32) -> (i32, i32) {
    %c0_i32 = arith.constant 0 : i32
    %c0_i32_0 = arith.constant 0 : i32
    %c0_i32_1 = arith.constant 0 : i32
    return %c0_i32, %c0_i32_0 : i32, i32
  }
  func.func @transform_7(%arg0: i32) -> (i32, i32) {
    %c0_i32 = arith.constant 0 : i32
    %c0_i32_0 = arith.constant 0 : i32
    %c0_i32_1 = arith.constant 0 : i32
    return %c0_i32, %c0_i32_0 : i32, i32
  }
}

</mosaic_0001>

<bundles_post_ra>
// kernel: _cnn_features_call.1
= control target key start
LH: loop header
LB: loop body
LE: loop exit
PB: predicated region body
PF: predicated region fallthrough
CT: control target
= control target key end

     0   :  { %12 = vsyncpa [#allocation3], 0  ;;  %s981_s0 = inlined_call_operand.vmem [shape: f32[1,256], index: 0, kind: input, shape index: {}]   ;;  %s982_s1 = inlined_call_operand.hbm [shape: f32[9,256], index: 1, kind: input, shape index: {}]   ;;  %s983_s2 = inlined_call_operand.hbm [shape: f32[72,256], index: 2, kind: input, shape index: {}]   ;;  %s984_s3 = inlined_call_operand.vmem [shape: bf16[8,9], index: 3, kind: input, shape index: {}]   ;;  %s985_s4 = inlined_call_operand.vmem [shape: f32[8,1], index: 4, kind: input, shape index: {}]   ;;  %s986_s5 = inlined_call_operand.vmem [shape: bf16[16,72], index: 5, kind: input, shape index: {}]   ;;  %s987_s6 = inlined_call_operand.vmem [shape: f32[16,1], index: 6, kind: input, shape index: {}]   ;;  %s988_s7 = inlined_call_operand.vmem [shape: f32[16,256], index: 7, kind: output, shape index: {}]  }
   0x1   :  { %s20_s26 = sshll.u32 %s982_s1, 4  ;;  %s21_s26 = int_to_ptr.hbm [resolvable:$true] %s20_s26 }
   0x2   :  { %13 = vsyncpa [#allocation5], 0  ;;  %s719_s27 = smov [#allocation2]   ;;  %s33_s8 = sshll.u32 %s983_s2, 4  ;;  %s34_s8 = int_to_ptr.hbm [resolvable:$true] %s33_s8 }
   0x3   :  { %s22_s28 = sshll.u32 %s719_s27, 4  ;;  %s720_s9 = smov 256   ;;  %s23_s28 = int_to_ptr.vmem [resolvable:$true] %s22_s28 }
   0x4   :  { %s721_s10 = smov 16   ;;  %s722_s11 = smov [#allocation4]  }
   0x5   :  { %28 = dma.hbm_to_vmem [thread:$0]  %s21_s26, 512, %s23_s28, [#allocation3], %s720_s9, %s720_s9, %s721_s10  }
   0x6   :  { %s35_s12 = sshll.u32 %s722_s11, 4  ;;  %s36_s12 = int_to_ptr.vmem [resolvable:$true] %s35_s12 }
   0x7   :  { %41 = dma.hbm_to_vmem [thread:$0]  %s34_s8, 2304, %s36_s12, [#allocation5], %s720_s9, %s720_s9, %s721_s10  }
   0x8   :  { %715 = dma.done.wait [#allocation3], 512  }
   0x9   :  { %716 = vsyncadd [#allocation3], 4294966784 }
   0xa   :  { %717 = dma.done.wait [#allocation5], 2304  }
   0xb   :  { %718 = vsyncadd [#allocation5], 4294964992  ;;  %v59_v0 = vld [vmem:[%s981_s0] sm:$0x3]  ;;  %s723_s2 = smov 1   ;;  %s724_s14 = smov 15   ;;  %v69_v4 = vlaneseq }
   0xc   :  { %v61_v1 = vperm.slane %v59_v0, 0  ;;  %v62_v2 = vperm.slane %v59_v0, 1  ;;  %s725_s15 = smov 17   ;;  %s726_s0 = smov 127   ;;  %vm302_vm4 = vcmask 1040384   ;;  %vm316_vm10 = vcmask 1041408  }
   0xd   :  { %s727_s16 = smov 112   ;;  %s728_s17 = smov 113   ;;  %v799_v5 = vand.u32 127, %v69_v4  ;;  %v108_v8 = vld [vmem:[#allocation2 + $0x2] ss:$8 sm:$0x3] }
   0xe   :  { %117 = vrot.lane.b32.xlu1 %v61_v1, %s723_s2  ;;  %83 = vrot.lane.b32.xlu0 %v61_v1, %s721_s10  ;;  %s729_s18 = smov 111   ;;  %v135_v10 = vld [vmem:[#allocation2 + $0x4] ss:$8 sm:$0x3]  ;;  %v110_v11 = vperm.slane %v108_v8, 0  ;;  %v111_v12 = vperm.slane %v108_v8, 1 }
   0xf   :  { %100 = vrot.lane.b32.xlu2 %v61_v1, %s724_s14  ;;  %vm104_vm0 = vcmp.lt.s32.totalorder %v799_v5, 15  ;;  %v136_v15 = vmul.f32 %v135_v10, %v59_v0  ;;  %v125_v16 = vld [vmem:[#allocation2 + $0x3] ss:$8 sm:$0x3]  ;;  %vm121_vm1 = vcmp.lt.s32.totalorder %v799_v5, 1  ;;  %vm87_vm2 = vcmp.lt.s32.totalorder %v799_v5, 16 }
  0x10   :  { %v91_v21 = vld [vmem:[#allocation2 + $0x1] ss:$8 sm:$0x3]  ;;  %v127_v24 = vperm.slane %v125_v16, 0  ;;  %v128_v25 = vperm.slane %v125_v16, 1  ;;  %vm71_vm3 = vcmp.lt.s32.totalorder %v799_v5, 17 }
  0x11   :  { %v138_v22 = vperm.slane %v136_v15, 0  ;;  %v139_v23 = vperm.slane %v136_v15, 1  ;;  %v93_v28 = vperm.slane %v91_v21, 0  ;;  %v94_v29 = vperm.slane %v91_v21, 1 }
  0x12   :  { %v74_v30 = vld [vmem:[#allocation2] ss:$8 sm:$0x3]  ;;  %v151_v53 = vld [vmem:[#allocation2 + $0x5] ss:$8 sm:$0x3] }
  0x13   :  { %v142_v35 = vpack.c.bf16 %v139_v23, %v138_v22  ;;  %v76_v38 = vperm.slane %v74_v30, 0  ;;  %v77_v39 = vperm.slane %v74_v30, 1  ;;  %vm303_vm5 = vsmask.f32 256 }
  0x14   :  { %v185_v55 = vld [vmem:[#allocation2 + $0x7] ss:$8 sm:$0x3]  ;;  %vm147_vm6 = vcmp.lt.s32.totalorder %v799_v5, 127  ;;  %v153_v59 = vperm.slane %v151_v53, 0  ;;  %v154_v60 = vperm.slane %v151_v53, 1  ;;  %vm847_vm9 = vmand %vm302_vm4, %vm303_vm5 }
  0x15   :  { %v254_v48 = vunpack.c.l.b16 %v142_v35  ;;  %v255_v49 = vunpack.c.h.b16 %v142_v35  ;;  %vm181_vm7 = vcmp.lt.s32.totalorder %v799_v5, 112  ;;  %v187_v0 = vperm.slane %v185_v55, 0 }
  0x16   :  { %119 = vrot.lane.b32.xlu1 %v62_v2, %s723_s2  ;;  %85 = vrot.lane.b32.xlu0 %v62_v2, %s721_s10  ;;  %vm164_vm8 = vcmp.lt.s32.totalorder %v799_v5, 113  ;;  %vm317_vm11 = vsmask.f32 1280  ;;  %vm330_vm12 = vcmask 1042432   ;;  %vm198_vm13 = vcmp.lt.s32.totalorder %v799_v5, 111 }
  0x17   :  { %102 = vrot.lane.b32.xlu2 %v62_v2, %s724_s14  ;;  %v826_v61 = vpack.c.b16 %v254_v48, %v254_v48  ;;  %v828_v62 = vpack.c.b16 %v255_v49, %v255_v49  ;;  %v202_v48 = vld [vmem:[#allocation2 + $0x10] ss:$8 sm:$0x3]  ;;  %vm866_vm14 = vmand %vm316_vm10, %vm317_vm11  ;;  %vm331_vm15 = vsmask.f32 2304  ;;  %vm344_vm5 = vcmask 1043456  }
  0x18   :  { %vm367_vm11 = vcmask 1044480  }
  0x1e   :  { %67 = vrot.lane.b32.xlu1 %v62_v2, %s725_s15  ;;  %65 = vrot.lane.b32.xlu0 %v61_v1, %s725_s15 }
  0x1f   :  { %143 = vrot.lane.b32.xlu2 %v61_v1, %s726_s0 }
  0x26   :  { %177 = vrot.lane.b32.xlu1 %v61_v1, %s727_s16  ;;  %145 = vrot.lane.b32.xlu0 %v62_v2, %s726_s0 }
  0x27   :  { %179 = vrot.lane.b32.xlu2 %v62_v2, %s727_s16 }
  0x2e   :  { %162 = vrot.lane.b32.xlu1 %v62_v2, %s728_s17  ;;  %160 = vrot.lane.b32.xlu0 %v61_v1, %s728_s17 }
  0x2f   :  { %194 = vrot.lane.b32.xlu2 %v61_v1, %s729_s18  ;;  %v188_v1 = vperm.slane %v185_v55, 1  ;;  %v259_v55 = vrot.slane %v828_v62, 6 }
  0x36   :  { %196 = vrot.lane.b32.xlu0 %v62_v2, %s729_s18 }
  0x69   :  { %v101_v3 = vpop.permute.xlu2 %100 }
  0x71   :  { %v103_v9 = vpop.permute.xlu2 %102 }
  0x72   :  { %v105_v13 = vsel %vm104_vm0, %v101_v3, %v103_v9  ;;  %v106_v14 = vsel %vm104_vm0, %v103_v9, %v101_v3  ;;  %v357_v9 = vld [vmem:[%s985_s4] sm:$0xff] }
  0x73   :  { %v114_v19 = vmul.f32 %v110_v11, %v106_v14  ;;  %v115_v20 = vmul.f32 %v111_v12, %v105_v13  ;;  %v730_v14 = vmov 0  }
  0x74   :  { %665 = vset.pattern.permute.xlu1 %v730_v14  ;;  %666 = vset.pattern.permute.xlu0 %v730_v14 }
  0x75   :  { %v116_v31 = vpack.c.bf16 %v115_v20, %v114_v19  ;;  %v168_v19 = vld [vmem:[#allocation2 + $0x6] ss:$8 sm:$0x3]  ;;  %360 = vperm.xlu1 %665, %v357_v9  }
  0x76   :  { %v171_v30 = vperm.slane %v168_v19, 1 }
  0x77   :  { %v232_v44 = vunpack.c.l.b16 %v116_v31  ;;  %v233_v45 = vunpack.c.h.b16 %v116_v31 }
  0x79   :  { %v144_v34 = vpop.permute.xlu2 %143  ;;  %v821_v56 = vpack.c.b16 %v232_v44, %v232_v44  ;;  %v823_v57 = vpack.c.b16 %v233_v45, %v233_v45 }
  0x7b   :  { %v236_v20 = vrot.slane %v821_v56, 7 }
  0x80   :  { %v118_v6 = vpop.permute.xlu1 %117  ;;  %v84_v7 = vpop.permute.xlu0 %83 }
  0x81   :  { %v180_v2 = vpop.permute.xlu2 %179 }
  0x88   :  { %v120_v17 = vpop.permute.xlu1 %119  ;;  %v86_v18 = vpop.permute.xlu0 %85 }
  0x89   :  { %v122_v26 = vsel %vm121_vm1, %v118_v6, %v120_v17  ;;  %v123_v27 = vsel %vm121_vm1, %v120_v17, %v118_v6  ;;  %v88_v32 = vsel %vm87_vm2, %v84_v7, %v86_v18  ;;  %v89_v33 = vsel %vm87_vm2, %v86_v18, %v84_v7 }
  0x8a   :  { %v131_v36 = vmul.f32 %v127_v24, %v123_v27  ;;  %v132_v37 = vmul.f32 %v128_v25, %v122_v26  ;;  %v97_v40 = vmul.f32 %v93_v28, %v89_v33  ;;  %v98_v41 = vmul.f32 %v94_v29, %v88_v32 }
  0x8b   :  { %v237_v28 = vrot.slane %v823_v57, 7  ;;  %v170_v29 = vperm.slane %v168_v19, 0  ;;  %v204_v57 = vperm.slane %v202_v48, 0 }
  0x8c   :  { %v133_v50 = vpack.c.bf16 %v132_v37, %v131_v36  ;;  %v99_v54 = vpack.c.bf16 %v98_v41, %v97_v40  ;;  %v258_v37 = vrot.slane %v826_v61, 6 }
  0x8e   :  { %v239_v63 = vunpack.c.l.b16 %v133_v50  ;;  %v240_v3 = vunpack.c.h.b16 %v133_v50  ;;  %v219_v4 = vunpack.c.l.b16 %v99_v54  ;;  %v220_v6 = vunpack.c.h.b16 %v99_v54 }
  0x90   :  { %v68_v42 = vpop.permute.xlu1 %67  ;;  %v66_v43 = vpop.permute.xlu0 %65  ;;  %v241_v21 = vpack.c.b16 %v239_v63, %v239_v63  ;;  %v242_v24 = vpack.c.b16 %v240_v3, %v240_v3  ;;  %v221_v25 = vpack.c.b16 %v219_v4, %v219_v4  ;;  %v222_v26 = vpack.c.b16 %v220_v6, %v220_v6 }
  0x91   :  { %v72_v46 = vsel %vm71_vm3, %v66_v43, %v68_v42  ;;  %v73_v47 = vsel %vm71_vm3, %v68_v42, %v66_v43  ;;  %v195_v4 = vpop.permute.xlu2 %194 }
  0x92   :  { %v80_v51 = vmul.f32 %v76_v38, %v73_v47  ;;  %v81_v52 = vmul.f32 %v77_v39, %v72_v46  ;;  %v244_v38 = vshll.u32 %v241_v21, 16  ;;  %v248_v39 = vshll.u32 %v242_v24, 16 }
  0x93   :  { %v224_v40 = vshll.u32 %v221_v25, 16  ;;  %v227_v41 = vshll.u32 %v222_v26, 16 }
  0x94   :  { %v82_v58 = vpack.c.bf16 %v81_v52, %v80_v51 }
  0x96   :  { %v212_v10 = vunpack.c.l.b16 %v82_v58  ;;  %v213_v11 = vunpack.c.h.b16 %v82_v58  ;;  %v205_v58 = vperm.slane %v202_v48, 1 }
  0x98   :  { %v178_v7 = vpop.permute.xlu1 %177  ;;  %v146_v8 = vpop.permute.xlu0 %145  ;;  %v214_v31 = vpack.c.b16 %v212_v10, %v212_v10  ;;  %v215_v32 = vpack.c.b16 %v213_v11, %v213_v11 }
  0x99   :  { %v148_v12 = vsel %vm147_vm6, %v144_v34, %v146_v8  ;;  %v149_v13 = vsel %vm147_vm6, %v146_v8, %v144_v34  ;;  %v182_v17 = vsel %vm181_vm7, %v178_v7, %v180_v2  ;;  %v183_v18 = vsel %vm181_vm7, %v180_v2, %v178_v7 }
  0x9a   :  { %v157_v15 = vmul.f32 %v153_v59, %v148_v12  ;;  %v158_v16 = vmul.f32 %v154_v60, %v149_v13  ;;  %v191_v22 = vmul.f32 %v187_v0, %v182_v17  ;;  %v192_v23 = vmul.f32 %v188_v1, %v183_v18 }
  0x9b   :  { %v305_v49 = vsel %vm847_vm9, %v214_v31, %v224_v40  ;;  %v306_v50 = vsel %vm847_vm9, %v215_v32, %v227_v41  ;;  %v246_v1 = vrot.slane %v244_v38, 7  ;;  %v250_v2 = vrot.slane %v248_v39, 7 }
  0x9c   :  { %v159_v27 = vpack.c.bf16 %v158_v16, %v157_v15  ;;  %v193_v36 = vpack.c.bf16 %v192_v23, %v191_v22  ;;  %v310_v59 = vsel %vm302_vm4, %v305_v49, %v236_v20  ;;  %v314_v60 = vsel %vm302_vm4, %v306_v50, %v237_v28  ;;  %vm879_vm4 = vmand %vm330_vm12, %vm331_vm15 }
  0x9d   :  { %v319_v11 = vsel %vm866_vm14, %v310_v59, %v246_v1  ;;  %v320_v12 = vsel %vm866_vm14, %v314_v60, %v250_v2  ;;  %vm345_vm9 = vsmask.f32 3328  ;;  %v731_v28 = vmov 65535   ;;  %v490_v1 = vld [vmem:[#allocation4 + $0x80] sm:$0xff]  ;;  %v491_v2 = vld [vmem:[#allocation4 + $0x88] sm:$0xff] }
  0x9e   :  { %v261_v33 = vunpack.c.l.b16 %v159_v27  ;;  %v262_v34 = vunpack.c.h.b16 %v159_v27  ;;  %v283_v53 = vunpack.c.l.b16 %v193_v36  ;;  %v284_v54 = vunpack.c.h.b16 %v193_v36  ;;  %vm346_vm14 = vmand %vm344_vm5, %vm345_vm9 }
  0x9f   :  { %v324_v25 = vsel %vm316_vm10, %v319_v11, %v258_v37  ;;  %v328_v26 = vsel %vm316_vm10, %v320_v12, %v259_v55  ;;  %vm363_vm10 = vcmask 72704  }
  0xa0   :  { %v163_v42 = vpop.permute.xlu1 %162  ;;  %v161_v43 = vpop.permute.xlu0 %160  ;;  %v263_v44 = vpack.c.b16 %v261_v33, %v261_v33  ;;  %v264_v45 = vpack.c.b16 %v262_v34, %v262_v34  ;;  %v285_v6 = vpack.c.b16 %v283_v53, %v283_v53  ;;  %v286_v7 = vpack.c.b16 %v284_v54, %v284_v54  ;;  %v447_v53 = vld [vmem:[#allocation4 + $0x48] sm:$0xff] }
  0xa1   :  { %v165_v46 = vsel %vm164_vm8, %v161_v43, %v163_v42  ;;  %v166_v47 = vsel %vm164_vm8, %v163_v42, %v161_v43 }
  0xa2   :  { %v174_v51 = vmul.f32 %v170_v29, %v165_v46  ;;  %v175_v52 = vmul.f32 %v171_v30, %v166_v47  ;;  %v266_v61 = vshll.u32 %v263_v44, 16  ;;  %v270_v63 = vshll.u32 %v264_v45, 16  ;;  %v356_v46 = vld [vmem:[%s984_s3] sm:$0xf] }
  0xa3   :  { %v288_v22 = vshll.u32 %v285_v6, 16  ;;  %v292_v23 = vshll.u32 %v286_v7, 16  ;;  %v368_v29 = vsel %vm344_vm5, 4294967295, %v731_v28 }
  0xa4   :  { %v176_v56 = vpack.c.bf16 %v175_v52, %v174_v51  ;;  %v268_v13 = vrot.slane %v266_v61, 6  ;;  %v272_v14 = vrot.slane %v270_v63, 6  ;;  %v369_v38 = vsel %vm367_vm11, %v368_v29, 0  ;;  %v446_v52 = vld [vmem:[#allocation4 + $0x40] sm:$0xff]  ;;  %v575_v61 = vld [vmem:[%s987_s6 + $0x8] sm:$0xff] }
  0xa5   :  { %v290_v35 = vrot.slane %v288_v22, 5  ;;  %v294_v36 = vrot.slane %v292_v23, 5 }
  0xa6   :  { %v276_v62 = vunpack.c.l.b16 %v176_v56  ;;  %v277_v3 = vunpack.c.h.b16 %v176_v56  ;;  %v333_v27 = vsel %vm879_vm4, %v324_v25, %v268_v13  ;;  %v334_v30 = vsel %vm879_vm4, %v328_v26, %v272_v14 }
  0xa8   :  { %v278_v8 = vpack.c.b16 %v276_v62, %v276_v62  ;;  %v279_v9 = vpack.c.b16 %v277_v3, %v277_v3  ;;  %v197_v10 = vpop.permute.xlu0 %196 }
  0xa9   :  { %v199_v15 = vsel %vm198_vm13, %v195_v4, %v197_v10  ;;  %v200_v16 = vsel %vm198_vm13, %v197_v10, %v195_v4 }
  0xaa   :  { %v280_v17 = vrot.slane %v278_v8, 5  ;;  %v281_v18 = vrot.slane %v279_v9, 5  ;;  %v208_v19 = vmul.f32 %v204_v57, %v199_v15  ;;  %v209_v20 = vmul.f32 %v205_v58, %v200_v16  ;;  %v468_v8 = vld [vmem:[#allocation4 + $0x60] sm:$0xff]  ;;  %v469_v9 = vld [vmem:[#allocation4 + $0x68] sm:$0xff] }
  0xac   :  { %v210_v24 = vpack.c.bf16 %v209_v20, %v208_v19  ;;  %v338_v32 = vsel %vm330_vm12, %v333_v27, %v280_v17  ;;  %v342_v34 = vsel %vm330_vm12, %v334_v30, %v281_v18  ;;  %v479_v19 = vld [vmem:[#allocation4 + $0x70] sm:$0xff]  ;;  %v480_v20 = vld [vmem:[#allocation4 + $0x78] sm:$0xff] }
  0xad   :  { %v347_v40 = vsel %vm346_vm14, %v338_v32, %v290_v35  ;;  %v348_v41 = vsel %vm346_vm14, %v342_v34, %v294_v36 }
  0xae   :  { %v298_v31 = vunpack.c.l.b16 %v210_v24  ;;  %v299_v33 = vunpack.c.h.b16 %v210_v24 }
  0xb0   :  { %v300_v37 = vpack.c.b16 %v298_v31, %v298_v31  ;;  %v301_v39 = vpack.c.b16 %v299_v33, %v299_v33 }
  0xb2   :  { %v352_v42 = vsel %vm344_vm5, %v347_v40, %v300_v37  ;;  %v355_v43 = vsel %vm344_vm5, %v348_v41, %v301_v39  ;;  %v457_v39 = vld [vmem:[#allocation4 + $0x50] sm:$0xff]  ;;  %v458_v40 = vld [vmem:[#allocation4 + $0x58] sm:$0xff] }
  0xb3   :  { %v370_v44 = vand.u32 %v369_v38, %v352_v42  ;;  %v372_v45 = vand.u32 %v369_v38, %v355_v43  ;;  %v574_v38 = vld [vmem:[%s987_s6] sm:$0xff] }
  0xb5   :  { %381 = vmatpush.bf16.msra.mxu0 %v370_v44  ;;  %394 = vmatpush.bf16.msra.mxu1 %v372_v45 }
  0xb8   :  { %643 = vmatmul.msk.bf16.vlgmr.msra.gmra.mxu0 %vm363_vm10, %v356_v46  ;;  %644 = vmatmul.msk.bf16.vlgmr.msra.gmra.mxu1 %vm363_vm10, %v356_v46 }
  0xe7   :  { %v361_v47 = vpop.permute.xlu1 %360 }
 0x135   :  { %v383_v48 = vpop.f32.mrf.mxu0  ;;  %v396_v49 = vpop.f32.mrf.mxu1 }
 0x136   :  { %v384_v50 = vadd.f32 %v383_v48, %v361_v47  ;;  %v397_v51 = vadd.f32 %v396_v49, %v361_v47  ;;  %v430_v49 = vld [vmem:[#allocation4 + $0x20] sm:$0xff] }
 0x138   :  { %v400_v54 = vmax.f32 %v384_v50, 0.0  ;;  %v401_v55 = vmax.f32 %v397_v51, 0.0  ;;  %v431_v50 = vld [vmem:[#allocation4 + $0x28] sm:$0xff] }
 0x13a   :  { %486 = vrot.lane.b32.xlu0 %v401_v55, %s729_s18  ;;  %462 = vrot.lane.b32.xlu1 %v400_v54, %s728_s17  ;;  %v448_v56 = vmul.f32 %v446_v52, %v400_v54  ;;  %v449_v57 = vmul.f32 %v447_v53, %v401_v55 }
 0x13b   :  { %484 = vrot.lane.b32.xlu2 %v400_v54, %s729_s18 }
 0x13c   :  { %v901_v58 = vpack.c.bf16 %v449_v57, %v448_v56 }
 0x13d   :  { %v385_v59 = vpop.f32.mrf.mxu0  ;;  %v398_v60 = vpop.f32.mrf.mxu1 }
 0x13e   :  { %v516_v57 = vunpack.c.l.b16 %v901_v58 }
 0x142   :  { %473 = vrot.lane.b32.xlu0 %v400_v54, %s727_s16  ;;  %475 = vrot.lane.b32.xlu1 %v401_v55, %s727_s16 }
 0x143   :  { %464 = vrot.lane.b32.xlu2 %v401_v55, %s728_s17 }
 0x14a   :  { %453 = vrot.lane.b32.xlu0 %v401_v55, %s726_s0  ;;  %424 = vrot.lane.b32.xlu1 %v400_v54, %s724_s14 }
 0x14b   :  { %451 = vrot.lane.b32.xlu2 %v400_v54, %s726_s0 }
 0x152   :  { %435 = vrot.lane.b32.xlu0 %v400_v54, %s723_s2  ;;  %437 = vrot.lane.b32.xlu1 %v401_v55, %s723_s2 }
 0x153   :  { %426 = vrot.lane.b32.xlu2 %v401_v55, %s724_s14 }
 0x15a   :  { %404 = vrot.lane.b32.xlu0 %v401_v55, %s725_s15  ;;  %413 = vrot.lane.b32.xlu1 %v400_v54, %s721_s10 }
 0x15b   :  { %402 = vrot.lane.b32.xlu2 %v400_v54, %s725_s15 }
 0x162   :  { %583 = vperm.xlu1 %665, %v575_v61   ;;  %578 = vperm.xlu0 %666, %v574_v38  }
 0x163   :  { %415 = vrot.lane.b32.xlu2 %v401_v55, %s721_s10 }
 0x195   :  { %v485_v63 = vpop.permute.xlu2 %484 }
 0x19d   :  { %v465_v0 = vpop.permute.xlu2 %464 }
 0x1a5   :  { %v452_v4 = vpop.permute.xlu2 %451 }
 0x1ac   :  { %v487_v62 = vpop.permute.xlu0 %486  ;;  %v463_v3 = vpop.permute.xlu1 %462 }
 0x1ad   :  { %v488_v6 = vsel %vm198_vm13, %v485_v63, %v487_v62  ;;  %v489_v7 = vsel %vm198_vm13, %v487_v62, %v485_v63  ;;  %v466_v10 = vsel %vm164_vm8, %v463_v3, %v465_v0  ;;  %v467_v11 = vsel %vm164_vm8, %v465_v0, %v463_v3  ;;  %v427_v32 = vpop.permute.xlu2 %426  ;;  %v441_v62 = vld [vmem:[#allocation4 + $0x30] sm:$0xff]  ;;  %v442_v3 = vld [vmem:[#allocation4 + $0x38] sm:$0xff] }
 0x1ae   :  { %v492_v12 = vmul.f32 %v490_v1, %v488_v6  ;;  %v493_v13 = vmul.f32 %v491_v2, %v489_v7  ;;  %v470_v14 = vmul.f32 %v468_v8, %v466_v10  ;;  %v471_v15 = vmul.f32 %v469_v9, %v467_v11 }
 0x1af   :  { %v517_v63 = vunpack.c.h.b16 %v901_v58 }
 0x1b0   :  { %v494_v16 = vpack.c.bf16 %v493_v13, %v492_v12  ;;  %v472_v21 = vpack.c.bf16 %v471_v15, %v470_v14 }
 0x1b1   :  { %v519_v10 = vpack.c.b16 %v517_v63, %v517_v63 }
 0x1b2   :  { %v536_v17 = vunpack.c.l.b16 %v494_v16  ;;  %v537_v18 = vunpack.c.h.b16 %v494_v16  ;;  %v526_v34 = vunpack.c.l.b16 %v472_v21  ;;  %v527_v35 = vunpack.c.h.b16 %v472_v21 }
 0x1b4   :  { %v474_v22 = vpop.permute.xlu0 %473  ;;  %v476_v23 = vpop.permute.xlu1 %475  ;;  %v538_v24 = vpack.c.b16 %v536_v17, %v536_v17  ;;  %v539_v25 = vpack.c.b16 %v537_v18, %v537_v18  ;;  %v528_v43 = vpack.c.b16 %v526_v34, %v526_v34  ;;  %v529_v45 = vpack.c.b16 %v527_v35, %v527_v35 }
 0x1b5   :  { %v477_v26 = vsel %vm181_vm7, %v474_v22, %v476_v23  ;;  %v478_v27 = vsel %vm181_vm7, %v476_v23, %v474_v22  ;;  %v403_v0 = vpop.permute.xlu2 %402 }
 0x1b6   :  { %v481_v28 = vmul.f32 %v479_v19, %v477_v26  ;;  %v482_v29 = vmul.f32 %v480_v20, %v478_v27  ;;  %v596_v30 = vsel %vm344_vm5, %v538_v24, 0  ;;  %v599_v31 = vsel %vm344_vm5, %v539_v25, 0  ;;  %v408_v20 = vld [vmem:[#allocation4] sm:$0xff]  ;;  %v409_v24 = vld [vmem:[#allocation4 + $0x8] sm:$0xff]  ;;  %v419_v25 = vld [vmem:[#allocation4 + $0x10] sm:$0xff] }
 0x1b7   :  { %604 = vmatpush.bf16.msra.mxu2 %v596_v30  ;;  %618 = vmatpush.bf16.msra.mxu3 %v599_v31  ;;  %v420_v26 = vld [vmem:[#allocation4 + $0x18] sm:$0xff] }
 0x1b8   :  { %v483_v33 = vpack.c.bf16 %v482_v29, %v481_v28 }
 0x1ba   :  { %v531_v36 = vunpack.c.l.b16 %v483_v33  ;;  %v532_v37 = vunpack.c.h.b16 %v483_v33 }
 0x1bc   :  { %v454_v41 = vpop.permute.xlu0 %453  ;;  %v425_v42 = vpop.permute.xlu1 %424  ;;  %v533_v44 = vpack.c.b16 %v531_v36, %v531_v36  ;;  %v534_v46 = vpack.c.b16 %v532_v37, %v532_v37 }
 0x1bd   :  { %v455_v47 = vsel %vm147_vm6, %v452_v4, %v454_v41  ;;  %v456_v48 = vsel %vm147_vm6, %v454_v41, %v452_v4  ;;  %v428_v51 = vsel %vm104_vm0, %v425_v42, %v427_v32  ;;  %v429_v52 = vsel %vm104_vm0, %v427_v32, %v425_v42  ;;  %v416_v23 = vpop.permute.xlu2 %415 }
 0x1be   :  { %v459_v53 = vmul.f32 %v457_v39, %v455_v47  ;;  %v460_v54 = vmul.f32 %v458_v40, %v456_v48  ;;  %v566_v55 = vsel %vm344_vm5, %v528_v43, %v533_v44  ;;  %v570_v56 = vsel %vm344_vm5, %v529_v45, %v534_v46 }
 0x1bf   :  { %v432_v60 = vmul.f32 %v430_v49, %v429_v52  ;;  %v433_v61 = vmul.f32 %v431_v50, %v428_v51  ;;  %605 = vmatpush.bf16.msra.mxu2 %v566_v55  ;;  %619 = vmatpush.bf16.msra.mxu3 %v570_v56  ;;  %v518_v4 = vpack.c.b16 %v516_v57, %v516_v57  ;;  %vm591_vm0 = vcmask 588800  }
 0x1c0   :  { %v461_v59 = vpack.c.bf16 %v460_v54, %v459_v53  ;;  %v651_v54 = vld [vmem:[%s986_s5] sm:$0xff] }
 0x1c1   :  { %v434_v6 = vpack.c.bf16 %v433_v61, %v432_v60 }
 0x1c2   :  { %v521_v1 = vunpack.c.l.b16 %v461_v59  ;;  %v522_v2 = vunpack.c.h.b16 %v461_v59 }
 0x1c3   :  { %v506_v18 = vunpack.c.l.b16 %v434_v6  ;;  %v507_v19 = vunpack.c.h.b16 %v434_v6 }
 0x1c4   :  { %v436_v7 = vpop.permute.xlu0 %435  ;;  %v438_v8 = vpop.permute.xlu1 %437  ;;  %v523_v9 = vpack.c.b16 %v521_v1, %v521_v1  ;;  %v524_v11 = vpack.c.b16 %v522_v2, %v522_v2 }
 0x1c5   :  { %v439_v12 = vsel %vm121_vm1, %v436_v7, %v438_v8  ;;  %v440_v13 = vsel %vm121_vm1, %v438_v8, %v436_v7  ;;  %v508_v29 = vpack.c.b16 %v506_v18, %v506_v18  ;;  %v509_v31 = vpack.c.b16 %v507_v19, %v507_v19 }
 0x1c6   :  { %v443_v14 = vmul.f32 %v441_v62, %v440_v13  ;;  %v444_v58 = vmul.f32 %v442_v3, %v439_v12  ;;  %v558_v15 = vsel %vm344_vm5, %v518_v4, %v523_v9  ;;  %v562_v16 = vsel %vm344_vm5, %v519_v10, %v524_v11 }
 0x1c7   :  { %606 = vmatpush.bf16.msra.mxu2 %v558_v15  ;;  %620 = vmatpush.bf16.msra.mxu3 %v562_v16 }
 0x1c8   :  { %v445_v17 = vpack.c.bf16 %v444_v58, %v443_v14 }
 0x1ca   :  { %v511_v21 = vunpack.c.l.b16 %v445_v17  ;;  %v512_v22 = vunpack.c.h.b16 %v445_v17 }
 0x1cc   :  { %v405_v27 = vpop.permute.xlu0 %404  ;;  %v414_v28 = vpop.permute.xlu1 %413  ;;  %v513_v30 = vpack.c.b16 %v511_v21, %v511_v21  ;;  %v514_v32 = vpack.c.b16 %v512_v22, %v512_v22 }
 0x1cd   :  { %v406_v33 = vsel %vm71_vm3, %v403_v0, %v405_v27  ;;  %v407_v34 = vsel %vm71_vm3, %v405_v27, %v403_v0  ;;  %v417_v35 = vsel %vm87_vm2, %v414_v28, %v416_v23  ;;  %v418_v36 = vsel %vm87_vm2, %v416_v23, %v414_v28 }
 0x1ce   :  { %v410_v37 = vmul.f32 %v408_v20, %v407_v34  ;;  %v411_v38 = vmul.f32 %v409_v24, %v406_v33  ;;  %v421_v39 = vmul.f32 %v419_v25, %v418_v36  ;;  %v422_v40 = vmul.f32 %v420_v26, %v417_v35 }
 0x1cf   :  { %v550_v41 = vsel %vm344_vm5, %v508_v29, %v513_v30  ;;  %v554_v42 = vsel %vm344_vm5, %v509_v31, %v514_v32 }
 0x1d0   :  { %v412_v43 = vpack.c.bf16 %v411_v38, %v410_v37  ;;  %v423_v44 = vpack.c.bf16 %v422_v40, %v421_v39  ;;  %607 = vmatpush.bf16.msra.mxu2 %v550_v41  ;;  %621 = vmatpush.bf16.msra.mxu3 %v554_v42 }
 0x1d2   :  { %v496_v45 = vunpack.c.l.b16 %v412_v43  ;;  %v501_v46 = vunpack.c.l.b16 %v423_v44  ;;  %v497_v47 = vunpack.c.h.b16 %v412_v43  ;;  %v502_v48 = vunpack.c.h.b16 %v423_v44 }
 0x1d4   :  { %v498_v49 = vpack.c.b16 %v496_v45, %v496_v45  ;;  %v503_v50 = vpack.c.b16 %v501_v46, %v501_v46  ;;  %v499_v5 = vpack.c.b16 %v497_v47, %v497_v47  ;;  %v504_v51 = vpack.c.b16 %v502_v48, %v502_v48  ;;  %v579_v55 = vpop.permute.xlu0 %578  ;;  %v584_v0 = vpop.permute.xlu1 %583 }
 0x1d6   :  { %v542_v52 = vsel %vm344_vm5, %v498_v49, %v503_v50  ;;  %v546_v53 = vsel %vm344_vm5, %v499_v5, %v504_v51 }
 0x1d7   :  { %608 = vmatpush.bf16.msra.mxu2 %v542_v52  ;;  %622 = vmatpush.bf16.msra.mxu3 %v546_v53 }
 0x1da   :  { %649 = vmatmul.msk.bf16.vlgmr.msra.gmra.mxu2 %vm591_vm0, %v651_v54  ;;  %650 = vmatmul.msk.bf16.vlgmr.msra.gmra.mxu3 %vm591_vm0, %v651_v54 }
 0x25d   :  { %v610_v56 = vpop.f32.mrf.mxu2  ;;  %v624_v57 = vpop.f32.mrf.mxu3 }
 0x25e   :  { %v611_v59 = vadd.f32 %v610_v56, %v579_v55  ;;  %v625_v60 = vadd.f32 %v624_v57, %v579_v55 }
 0x260   :  { %v629_v61 = vmax.f32 %v611_v59, 0.0  ;;  %v630_v63 = vmax.f32 %v625_v60, 0.0 }
 0x262   :  { %633 = vst [vmem:[%s988_s7] sm:$0xff] %v629_v61 }
 0x263   :  { %634 = vst [vmem:[%s988_s7 + $0x8] sm:$0xff] %v630_v63 }
 0x265   :  { %v612_v1 = vpop.f32.mrf.mxu2  ;;  %v626_v2 = vpop.f32.mrf.mxu3 }
 0x266   :  { %v613_v62 = vadd.f32 %v612_v1, %v584_v0  ;;  %v627_v3 = vadd.f32 %v626_v2, %v584_v0 }
 0x268   :  { %v631_v4 = vmax.f32 %v613_v62, 0.0  ;;  %v632_v6 = vmax.f32 %v627_v3, 0.0 }
 0x26a   :  { %635 = vst [vmem:[%s988_s7 + $0x10] sm:$0xff] %v631_v4 }
 0x26b   :  { %636 = vst [vmem:[%s988_s7 + $0x18] sm:$0xff] %v632_v6 }
 0x26c   :  { %641 = vsyncpa [#allocation3], 1 }
 0x26d   :  { %642 = vsyncpa [#allocation5], 1 }

</bundles_post_ra>
